<compile_context>
chip_gen: v7x
topology: tpu7x:2x2x1
jax: 0.10.0
libtpu: 0.0.40
codegen_flags: <defaults>
</compile_context>

<pallas_src>
import functools

import jax
import jax.numpy as jnp
from jax.experimental import pallas as pl
from jax.experimental.pallas import tpu as pltpu

_LANE = 128
_TILE_BYTES_DENSE = 4 * 1024 * 1024     # per-operand tile target, dense path (3 streams)
_TILE_BYTES_LABEL = 8 * 1024 * 1024     # per-operand tile target, label path (2 big streams)
_VMEM_BUDGET_BYTES = 28 * 1024 * 1024   # cap on total double-buffered VMEM residency
_VMEM_LIMIT_BYTES = 40 * 1024 * 1024    # scoped VMEM limit (ok on v7x 64MiB / v5e,v6e 128MiB phys)
_MIN_PALLAS_BYTES = 1 * 1024 * 1024     # below this, XLA elementwise fusion beats a custom call


def _cdiv(a, b):
    return -(-a // b)


def _round_up(a, b):
    return _cdiv(a, b) * b


def _sublane_pack(dtype):
    # Native sublane tile rows: 8 for 4-byte, 16 for 2-byte, 32 for 1-byte dtypes.
    itemsize = jnp.dtype(dtype).itemsize
    if itemsize == 1:
        return 32
    if itemsize == 2:
        return 16
    return 8


@functools.lru_cache(maxsize=None)
def _num_tensorcores():
    """Best-effort TensorCore-per-device count (2 on v7x, 1 on v5e/v6e)."""
    try:
        info = pltpu.get_tpu_info()
        for name in ("num_cores", "core_count", "num_tensor_cores", "tensorcore_count"):
            v = getattr(info, name, None)
            if isinstance(v, int) and v > 0:
                return min(int(v), 2)
    except Exception:
        pass
    try:
        dev = jax.devices()[0]
        if dev.platform == "tpu":
            for name in ("num_cores", "core_count"):
                v = getattr(dev, name, None)
                if isinstance(v, int) and v > 0:
                    return min(int(v), 2)
    except Exception:
        pass
    return 1


def _pick_block_c(n_cols, itemsize, pack):
    # Full C unless it is a (very large) multiple of 128; a full-C block is
    # always legal (block dim == array dim).
    if n_cols % _LANE != 0:
        return n_cols
    max_cols = max(_LANE, (_TILE_BYTES_DENSE // (pack * itemsize)) // _LANE * _LANE)
    return min(n_cols, max_cols)


def _pick_block_n(rows, tile_row_bytes, total_row_bytes, pack, tile_target):
    """Rows per block from (a) per-operand tile target and (b) total VMEM budget."""
    bn_tile = tile_target // max(tile_row_bytes, 1)
    bn_budget = _VMEM_BUDGET_BYTES // max(2 * total_row_bytes, 1)  # x2 double-buffering
    bn = int(min(bn_tile, bn_budget))
    if bn >= rows:
        return rows
    return max((bn // pack) * pack, pack)   # sublane-aligned, unmasked rows


def _megacore_adjust(block_n, rows, n_col_blocks, pack):
    """On 2-TC chips, make small grids have an even (core-divisible) step count."""
    cores = _num_tensorcores()
    if cores < 2 or n_col_blocks != 1:
        return block_n
    n_row_blocks = _cdiv(rows, block_n)
    if n_row_blocks >= 2 * cores:
        return block_n                       # plenty of steps to balance already
    want = _round_up(max(n_row_blocks, cores), cores)
    new_bn = _round_up(_cdiv(rows, want), pack)
    if new_bn >= pack and _cdiv(rows, new_bn) >= cores:
        return min(new_bn, rows)
    return block_n                           # too little work to split


def _lane_dense_width(total):
    """Largest width w = 128*k (k <= 32) with total % w == 0, else None."""
    max_k = min(32, total // _LANE)
    for k in range(max_k, 0, -1):
        w = _LANE * k
        if total % w == 0:
            return w
    return None


# ----------------------------------------------------------------------------
# Kernels (pure VPU elementwise work on the current VMEM tile).
# ----------------------------------------------------------------------------

def _am_dense_kernel(out_ref, tgt_ref, pred_ref, *, margin, scale):
    o = out_ref[...]
    t = tgt_ref[...]
    pred_ref[...] = (scale * (o - margin * t)).astype(pred_ref.dtype)


def _am_label_kernel(out_ref, lbl_ref, pred_ref, *, margin, scale, block_c):
    j = pl.program_id(1)
    o = out_ref[...]
    # Shift the (bn, 1) label column instead of adding j*block_c to the full-tile iota.
    lbl_local = lbl_ref[...] - j * block_c                        # (bn, 1) int32
    col = jax.lax.broadcasted_iota(jnp.int32, o.shape, 1)         # (bn, block_c)
    is_tgt = col == lbl_local
    m = jnp.where(is_tgt, jnp.asarray(margin, dtype=o.dtype),
                  jnp.asarray(0, dtype=o.dtype))
    pred_ref[...] = (scale * (o - m)).astype(pred_ref.dtype)


# ----------------------------------------------------------------------------
# Wrappers.
# ----------------------------------------------------------------------------

def angular_margin(outputs, targets, margin=0.0, scale=1.0,
                   *, min_pallas_bytes=_MIN_PALLAS_BYTES, donate_outputs=False):
    """predictions = scale * (outputs - margin * targets); outputs/targets [N, C]."""
    assert outputs.shape == targets.shape, "outputs and targets must match shape"
    N, C = outputs.shape
    dtype = outputs.dtype
    itemsize = jnp.dtype(dtype).itemsize
    margin = float(margin)
    scale = float(scale)

    # Degenerate parameters (SpeechBrain defaults): no margin pass needed.
    if margin == 0.0:
        if scale == 1.0:
            return outputs
        return (scale * outputs).astype(dtype)   # trivial scalar-mul; XLA fuses at roofline

    def _xla():
        return (scale * (outputs - margin * targets)).astype(dtype)

    if N * C * itemsize < min_pallas_bytes:
        return _xla()   # custom-call overhead dominates; let XLA fuse it

    # Lane-dense reflow when C is not a multiple of 128 (legal: op is elementwise).
    rows, cols = N, C
    o2, t2 = outputs, targets
    if C % _LANE != 0:
        w = _lane_dense_width(N * C)
        if w is not None:
            rows, cols = (N * C) // w, w
            o2 = outputs.reshape(rows, cols)
            t2 = targets.reshape(rows, cols)
        elif C < 2 * _LANE:
            # Narrow awkward C with no lane-dense reflow: masked vst.msk on most
            # lanes would dominate -> XLA elementwise is strictly better here.
            return _xla()
        # else: wide-C fallback; only the final lane group per row is masked.

    pack = _sublane_pack(dtype)
    block_c = _pick_block_c(cols, itemsize, pack)
    row_bytes = block_c * itemsize
    block_n = _pick_block_n(rows, row_bytes, 3 * row_bytes, pack, _TILE_BYTES_DENSE)
    block_n = _megacore_adjust(block_n, rows, _cdiv(cols, block_c), pack)
    if 2 * block_n * 3 * row_bytes > _VMEM_LIMIT_BYTES:
        return _xla()   # TODO(synk): tile the huge, non-128-multiple-C case instead
    grid = (_cdiv(rows, block_n), _cdiv(cols, block_c))

    kernel = functools.partial(_am_dense_kernel, margin=margin, scale=scale)
    out = pl.pallas_call(
        kernel,
        out_shape=jax.ShapeDtypeStruct((rows, cols), dtype),
        grid_spec=pltpu.PrefetchScalarGridSpec(
            num_scalar_prefetch=0,
            grid=grid,
            in_specs=[
                pl.BlockSpec((block_n, block_c), lambda i, j: (i, j)),
                pl.BlockSpec((block_n, block_c), lambda i, j: (i, j)),
            ],
            out_specs=pl.BlockSpec((block_n, block_c), lambda i, j: (i, j)),
        ),
        compiler_params=pltpu.CompilerParams(
            dimension_semantics=("parallel", "parallel"),
            vmem_limit_bytes=_VMEM_LIMIT_BYTES,
        ),
        cost_estimate=pl.CostEstimate(
            flops=3 * rows * cols,
            transcendentals=0,
            bytes_accessed=3 * rows * cols * itemsize,
        ),
        input_output_aliases={0: 0} if donate_outputs else {},
    )(o2, t2)
    return out.reshape(N, C)


def angular_margin_from_labels(outputs, labels, margin=0.0, scale=1.0,
                               *, min_pallas_bytes=_MIN_PALLAS_BYTES,
                               donate_outputs=False):
    """Same as angular_margin with one-hot targets built from integer `labels` [N].

    Avoids streaming a dense one-hot [N, C] targets matrix from HBM.
    Out-of-range / negative labels behave like one_hot of an invalid index
    (no margin applied to that row).
    """
    N, C = outputs.shape
    dtype = outputs.dtype
    itemsize = jnp.dtype(dtype).itemsize
    margin = float(margin)
    scale = float(scale)
    labels = labels.astype(jnp.int32)

    # Degenerate parameters (SpeechBrain defaults).
    if margin == 0.0:
        if scale == 1.0:
            return outputs
        return (scale * outputs).astype(dtype)

    if scale == 1.0 and donate_outputs:
        # O(N) in-place scatter: subtract the margin only at the N label positions
        # instead of streaming the full [N, C] matrix (orders of magnitude less HBM).
        row_idx = jnp.arange(N, dtype=jnp.int32)
        safe = jnp.logical_and(labels >= 0, labels < C)
        col_idx = jnp.where(safe, labels, C)            # C is OOB -> dropped
        return outputs.at[row_idx, col_idx].add(-margin, mode="drop")

    def _xla():
        one_hot = (labels[:, None] == jnp.arange(C, dtype=jnp.int32)[None, :]).astype(dtype)
        return (scale * (outputs - margin * one_hot)).astype(dtype)

    if N * C * itemsize < min_pallas_bytes:
        return _xla()

    pack = _sublane_pack(dtype)
    block_c = _pick_block_c(C, itemsize, pack)
    row_bytes = block_c * itemsize
    # Total per-row residency: outputs + preds tiles plus the lane-padded (bn,128)
    # int32 label buffer.
    total_row_bytes = 2 * row_bytes + _LANE * 4
    block_n = _pick_block_n(N, row_bytes, total_row_bytes, pack, _TILE_BYTES_LABEL)
    block_n = _megacore_adjust(block_n, N, _cdiv(C, block_c), pack)
    if 2 * block_n * total_row_bytes > _VMEM_LIMIT_BYTES:
        return _xla()   # TODO(synk): tile the huge, non-128-multiple-C case instead
    grid = (_cdiv(N, block_n), _cdiv(C, block_c))

    kernel = functools.partial(_am_label_kernel, margin=margin, scale=scale,
                               block_c=block_c)
    return pl.pallas_call(
        kernel,
        out_shape=jax.ShapeDtypeStruct((N, C), dtype),
        grid_spec=pltpu.PrefetchScalarGridSpec(
            num_scalar_prefetch=0,
            grid=grid,
            in_specs=[
                pl.BlockSpec((block_n, block_c), lambda i, j: (i, j)),  # outputs
                pl.BlockSpec((block_n, 1), lambda i, j: (i, 0)),        # labels [N,1]
            ],
            out_specs=pl.BlockSpec((block_n, block_c), lambda i, j: (i, j)),
        ),
        compiler_params=pltpu.CompilerParams(
            dimension_semantics=("parallel", "parallel"),
            vmem_limit_bytes=_VMEM_LIMIT_BYTES,
        ),
        cost_estimate=pl.CostEstimate(
            flops=3 * N * C,
            transcendentals=0,
            bytes_accessed=2 * N * C * itemsize + N * 4,
        ),
        input_output_aliases={0: 0} if donate_outputs else {},
    )(outputs, labels.reshape(N, 1))


if __name__ == "__main__":
    key = jax.random.PRNGKey(0)
    k1, k2, k3, k4, k5 = jax.random.split(key, 5)

    margin, scale = 0.2, 30.0

    # 1) Label-path kernel (no dense one-hot streamed from HBM).
    N, C = 64, 256
    outputs = jnp.tanh(jax.random.normal(k1, (N, C), dtype=jnp.float32))
    labels = jax.random.randint(k2, (N,), 0, C)
    preds = jax.block_until_ready(
        angular_margin_from_labels(outputs, labels, margin, scale, min_pallas_bytes=0))
    targets = jax.nn.one_hot(labels, C, dtype=jnp.float32)
    ref = scale * (outputs - margin * targets)
    assert jnp.allclose(preds, ref, atol=1e-5, rtol=1e-5), "label-path mismatch"

    # 2) Dense-targets kernel, C not a multiple of 128: wrapper reflows
    #    (16, 40) -> lane-dense (1, 640) slab for unmasked stores.
    N2, C2 = 16, 40
    out2 = jnp.tanh(jax.random.normal(k3, (N2, C2), dtype=jnp.float32))
    lab2 = jax.random.randint(k4, (N2,), 0, C2)
    tgt2 = jax.nn.one_hot(lab2, C2, dtype=jnp.float32)
    pred2 = jax.block_until_ready(
        angular_margin(out2, tgt2, margin, scale, min_pallas_bytes=0))
    ref2 = scale * (out2 - margin * tgt2)
    assert jnp.allclose(pred2, ref2, atol=1e-5, rtol=1e-5), "dense-path mismatch"

    # 3) Dense-targets kernel with C a multiple of 128 (standard tiling path).
    N3, C3 = 32, 256
    out3 = jnp.tanh(jax.random.normal(k5, (N3, C3), dtype=jnp.float32))
    tgt3 = jax.nn.one_hot(jnp.arange(N3) % C3, C3, dtype=jnp.float32)
    pred3 = jax.block_until_ready(
        angular_margin(out3, tgt3, margin, scale, min_pallas_bytes=0))
    ref3 = scale * (out3 - margin * tgt3)
    assert jnp.allclose(pred3, ref3, atol=1e-5, rtol=1e-5), "dense-128 mismatch"

    # 4) O(N) scatter fast path (scale == 1, donated outputs).
    pred4 = jax.block_until_ready(
        angular_margin_from_labels(outputs, labels, margin, 1.0, donate_outputs=True))
    ref4 = outputs - margin * targets
    assert jnp.allclose(pred4, ref4, atol=1e-6, rtol=1e-6), "scatter-path mismatch"

    # 5) Docstring example semantics (margin=0, scale=1) — identity fast path.
    ex_out = jnp.array([[1., -1.], [-1., 1.], [0.9, 0.1], [0.1, 0.9]], jnp.float32)
    ex_tgt = jnp.array([[1., 0.], [0., 1.], [1., 0.], [0., 1.]], jnp.float32)
    ex_pred = jax.block_until_ready(angular_margin(ex_out, ex_tgt))
    assert bool(jnp.all((ex_pred[:, 0] > ex_pred[:, 1])
                        == jnp.array([True, False, True, False])))

    print("KERNEL_OK")
</pallas_src>

<mosaic_0001>
module attributes {stable_mosaic.version = 11 : i64} {
  func.func @_am_label_kernel(%arg0: i32, %arg1: i32, %arg2: memref<64x256xf32, #tpu.memory_space<vmem>>, %arg3: memref<64x1xi32, #tpu.memory_space<vmem>>, %arg4: memref<64x256xf32, #tpu.memory_space<vmem>>) attributes {dimension_semantics = [#tpu.dimension_semantics<parallel>, #tpu.dimension_semantics<parallel>], iteration_bounds = array<i64: 1, 1>, scalar_prefetch = 0 : i64, scratch_operands = 0 : i64, tpu.core_type = #tpu.core_type<tc>, window_params = [{transform_indices = @transform_0, window_bounds = array<i64: 64, 256>}, {transform_indices = @transform_1, window_bounds = array<i64: 64, 1>}, {transform_indices = @transform_2, window_bounds = array<i64: 64, 256>}]} {
    %c0 = arith.constant 0 : index
    %c0_0 = arith.constant 0 : index
    %0 = vector.load %arg2[%c0, %c0_0] : memref<64x256xf32, #tpu.memory_space<vmem>>, vector<64x256xf32>
    %c0_1 = arith.constant 0 : index
    %c0_2 = arith.constant 0 : index
    %1 = vector.load %arg3[%c0_1, %c0_2] : memref<64x1xi32, #tpu.memory_space<vmem>>, vector<64x1xi32>
    %c256_i32 = arith.constant 256 : i32
    %2 = arith.muli %arg1, %c256_i32 : i32
    %3 = vector.broadcast %2 : i32 to vector<64x1xi32>
    %4 = arith.subi %1, %3 : vector<64x1xi32>
    %5 = tpu.iota {dimensions = array<i32: 1>} : vector<64x256xi32>
    %6 = vector.broadcast %4 : vector<64x1xi32> to vector<64x256xi32>
    %7 = arith.cmpi eq, %5, %6 : vector<64x256xi32>
    %cst = arith.constant 2.000000e-01 : f32
    %cst_3 = arith.constant 0.000000e+00 : f32
    %8 = vector.broadcast %cst : f32 to vector<64x256xf32>
    %9 = vector.broadcast %cst_3 : f32 to vector<64x256xf32>
    %10 = arith.select %7, %8, %9 : vector<64x256xi1>, vector<64x256xf32>
    %11 = arith.subf %0, %10 : vector<64x256xf32>
    %cst_4 = arith.constant 3.000000e+01 : f32
    %12 = vector.broadcast %cst_4 : f32 to vector<64x256xf32>
    %13 = arith.mulf %12, %11 : vector<64x256xf32>
    %c0_5 = arith.constant 0 : index
    %c0_6 = arith.constant 0 : index
    %14 = vector.load %arg4[%c0_5, %c0_6] : memref<64x256xf32, #tpu.memory_space<vmem>>, vector<64x256xf32>
    tpu.vector_store %arg4[%c0_5, %c0_6], %13 {strides = array<i32>} : memref<64x256xf32, #tpu.memory_space<vmem>>, vector<64x256xf32>,
    return
  }
  func.func @transform_0(%arg0: i32, %arg1: i32) -> (i32, i32) {
    %c0_i32 = arith.constant 0 : i32
    return %arg0, %arg1 : i32, i32
  }
  func.func @transform_1(%arg0: i32, %arg1: i32) -> (i32, i32) {
    %c0_i32 = arith.constant 0 : i32
    %c0_i32_0 = arith.constant 0 : i32
    return %arg0, %c0_i32 : i32, i32
  }
  func.func @transform_2(%arg0: i32, %arg1: i32) -> (i32, i32) {
    %c0_i32 = arith.constant 0 : i32
    return %arg0, %arg1 : i32, i32
  }
}

</mosaic_0001>

<bundles_post_ra>
// kernel: tpu_custom_call.1
= control target key start
LH: loop header
LB: loop body
LE: loop exit
PB: predicated region body
PF: predicated region fallthrough
CT: control target
= control target key end

     0   :  { %7 = vsyncpa [#allocation3], 0  ;;  %s352_s0 = inlined_call_operand.hbm [shape: f32[64,256], index: 0, kind: input, shape index: {}]   ;;  %s353_s1 = inlined_call_operand.vmem [shape: s32[64,1], index: 1, kind: input, shape index: {}]   ;;  %s354_s2 = inlined_call_operand.hbm [shape: f32[64,256], index: 2, kind: output, shape index: {}]  }
   0x1   :  { %8 = vsyncpa [#allocation4], 0  ;;  %s240_s9 = smov [#allocation2]   ;;  %s192_s13 = scalar_lea.hbm %s352_s0, 2048 }
   0x2   :  { %s14_s10 = sshll.u32 %s240_s9, 4  ;;  %p193_p0 = scmp.ne.s32.totalorder %s352_s0, %s192_s13  ;;  %s15_s10 = int_to_ptr.vmem [resolvable:$true] %s14_s10 }
   0x3   :  { %p196_p1 = scmp.lt.u32.totalorder %s192_s13, %s352_s0 }
   0x5   :  { %p198_p2 = pnand %p196_p1, %p193_p0 }
   0x7   :  { %201 = shalt.err (!%p198_p2)
}
   0x8   :  { %s202_s18 = scalar_lea.vmem %s15_s10, 2048  ;;  %p207_p4 = scmp.lt.s32.totalorder %s15_s10, %s15_s10 }
   0x9   :  { %p203_p3 = scmp.ne.s32.totalorder %s15_s10, %s202_s18  ;;  %p208_p5 = scmp.lt.s32.totalorder %s202_s18, %s202_s18 }
   0xb   :  { %p209_p6 = por %p208_p5, %p207_p4 }
   0xd   :  { %p210_p7 = pnand %p209_p6, %p203_p3 }
   0xf   :  { %213 = shalt.err (!%p210_p7)
}
  0x10   :  { %s241_s19 = smov 256   ;;  %s242_s20 = smov 16  }
  0x11   :  { %20 = dma.hbm_to_vmem [thread:$0]  %s352_s0, 2048, %s15_s10, [#allocation3], %s241_s19, %s241_s19, %s242_s20  }
  0x12   :  { %236 = dma.done.wait [#allocation3], 2048  }
  0x13   :  { %237 = vsyncadd [#allocation3], 4294965248  ;;  %v243_v0 = vmov 0   ;;  %v44_v1 = vld [vmem:[%s353_s1 + $0x10] sm:$0xff]  ;;  %v42_v2 = vld [vmem:[%s353_s1] sm:$0xff]  ;;  %v60_v9 = vlaneseq  ;;  %v244_v18 = vmov 0.0  }
  0x14   :  { %191 = vset.pattern.permute.xlu1 %v243_v0  ;;  %190 = vset.pattern.permute.xlu0 %v243_v0  ;;  %v45_v3 = vld [vmem:[%s353_s1 + $0x18] sm:$0xff]  ;;  %v43_v4 = vld [vmem:[%s353_s1 + $0x8] sm:$0xff]  ;;  %v46_v6 = vld [vmem:[%s353_s1 + $0x20] sm:$0xff] }
  0x15   :  { %70 = vperm.xlu1 %191, %v44_v1   ;;  %64 = vperm.xlu0 %190, %v42_v2   ;;  %v47_v5 = vld [vmem:[%s353_s1 + $0x28] sm:$0xff]  ;;  %v49_v7 = vld [vmem:[%s353_s1 + $0x38] sm:$0xff]  ;;  %v48_v8 = vld [vmem:[%s353_s1 + $0x30] sm:$0xff]  ;;  %v300_v10 = vand.u32 127, %v60_v9  ;;  %s245_s1 = smov [#allocation5]  }
  0x16   :  { %v30_v13 = vld [vmem:[#allocation2 + $0x20] sm:$0xff]  ;;  %v31_v14 = vld [vmem:[#allocation2 + $0x28] sm:$0xff]  ;;  %v32_v28 = vld [vmem:[#allocation2 + $0x30] sm:$0xff]  ;;  %s172_s10 = sshll.u32 %s245_s1, 4  ;;  %s173_s10 = int_to_ptr.vmem [resolvable:$true] %s172_s10 }
  0x17   :  { %v303_v11 = vadd.s32 128, %v300_v10  ;;  %v26_v16 = vld [vmem:[#allocation2] sm:$0xff]  ;;  %v27_v17 = vld [vmem:[#allocation2 + $0x8] sm:$0xff]  ;;  %v33_v33 = vld [vmem:[#allocation2 + $0x38] sm:$0xff]  ;;  %s214_s11 = scalar_lea.vmem %s173_s10, 2048  ;;  %p219_p9 = scmp.lt.s32.totalorder %s173_s10, %s173_s10 }
  0x18   :  { %v28_v34 = vld [vmem:[#allocation2 + $0x10] sm:$0xff]  ;;  %v29_v37 = vld [vmem:[#allocation2 + $0x18] sm:$0xff]  ;;  %v34_v50 = vld [vmem:[#allocation2 + $0x40] sm:$0xff]  ;;  %p215_p8 = scmp.ne.s32.totalorder %s173_s10, %s214_s11  ;;  %p220_p10 = scmp.lt.s32.totalorder %s214_s11, %s214_s11 }
  0x19   :  { %73 = vperm.xlu1 %191, %v45_v3   ;;  %67 = vperm.xlu0 %190, %v43_v4   ;;  %v36_v45 = vld [vmem:[#allocation2 + $0x50] sm:$0xff]  ;;  %v37_v46 = vld [vmem:[#allocation2 + $0x58] sm:$0xff]  ;;  %v35_v58 = vld [vmem:[#allocation2 + $0x48] sm:$0xff] }
  0x1a   :  { %v40_v2 = vld [vmem:[#allocation2 + $0x70] sm:$0xff]  ;;  %v41_v3 = vld [vmem:[#allocation2 + $0x78] sm:$0xff]  ;;  %v39_v9 = vld [vmem:[#allocation2 + $0x68] sm:$0xff]  ;;  %p221_p11 = por %p220_p10, %p219_p9 }
  0x1c   :  { %p222_p12 = pnand %p221_p11, %p215_p8 }
  0x1d   :  { %79 = vperm.xlu1 %191, %v47_v5   ;;  %76 = vperm.xlu0 %190, %v46_v6   ;;  %v38_v5 = vld [vmem:[#allocation2 + $0x60] sm:$0xff] }
  0x21   :  { %85 = vperm.xlu1 %191, %v49_v7   ;;  %82 = vperm.xlu0 %190, %v48_v8  }
  0x94   :  { %v71_v12 = vpop.permute.xlu1 %70  ;;  %v65_v15 = vpop.permute.xlu0 %64 }
  0x95   :  { %vm91_vm0 = vcmp.eq.s32.totalorder %v300_v10, %v71_v12  ;;  %vm92_vm1 = vcmp.eq.s32.totalorder %v303_v11, %v71_v12  ;;  %vm87_vm2 = vcmp.eq.s32.totalorder %v300_v10, %v65_v15  ;;  %vm88_vm3 = vcmp.eq.s32.totalorder %v303_v11, %v65_v15 }
  0x96   :  { %v107_v19 = vsel %vm91_vm0, 0.2, %v244_v18  ;;  %v108_v20 = vsel %vm92_vm1, 0.2, %v244_v18  ;;  %v103_v21 = vsel %vm87_vm2, 0.2, %v244_v18 }
  0x97   :  { %v123_v22 = vsub.f32 %v30_v13, %v107_v19  ;;  %v124_v23 = vsub.f32 %v31_v14, %v108_v20  ;;  %v104_v24 = vsel %vm88_vm3, 0.2, %v244_v18  ;;  %v119_v25 = vsub.f32 %v26_v16, %v103_v21 }
  0x98   :  { %v120_v26 = vsub.f32 %v27_v17, %v104_v24  ;;  %v74_v27 = vpop.permute.xlu1 %73  ;;  %v68_v29 = vpop.permute.xlu0 %67 }
  0x99   :  { %v139_v30 = vmul.f32 30.0, %v123_v22  ;;  %v140_v31 = vmul.f32 30.0, %v124_v23  ;;  %v135_v32 = vmul.f32 30.0, %v119_v25  ;;  %vm93_vm4 = vcmp.eq.s32.totalorder %v300_v10, %v74_v27 }
  0x9a   :  { %v136_v35 = vmul.f32 30.0, %v120_v26  ;;  %vm94_vm5 = vcmp.eq.s32.totalorder %v303_v11, %v74_v27  ;;  %v109_v36 = vsel %vm93_vm4, 0.2, %v244_v18  ;;  %vm89_vm6 = vcmp.eq.s32.totalorder %v300_v10, %v68_v29 }
  0x9b   :  { %155 = vst [vmem:[#allocation5 + $0x20] sm:$0xff] %v139_v30  ;;  %156 = vst [vmem:[#allocation5 + $0x28] sm:$0xff] %v140_v31  ;;  %v110_v38 = vsel %vm94_vm5, 0.2, %v244_v18  ;;  %v125_v39 = vsub.f32 %v32_v28, %v109_v36  ;;  %vm90_vm7 = vcmp.eq.s32.totalorder %v303_v11, %v68_v29  ;;  %v105_v40 = vsel %vm89_vm6, 0.2, %v244_v18 }
  0x9c   :  { %151 = vst [vmem:[#allocation5] sm:$0xff] %v135_v32  ;;  %152 = vst [vmem:[#allocation5 + $0x8] sm:$0xff] %v136_v35  ;;  %v126_v41 = vsub.f32 %v33_v33, %v110_v38  ;;  %v106_v42 = vsel %vm90_vm7, 0.2, %v244_v18  ;;  %v121_v43 = vsub.f32 %v28_v34, %v105_v40  ;;  %v80_v44 = vpop.permute.xlu1 %79  ;;  %v77_v47 = vpop.permute.xlu0 %76 }
  0x9d   :  { %v141_v48 = vmul.f32 30.0, %v125_v39  ;;  %v122_v49 = vsub.f32 %v29_v37, %v106_v42  ;;  %vm97_vm8 = vcmp.eq.s32.totalorder %v300_v10, %v80_v44  ;;  %vm98_vm9 = vcmp.eq.s32.totalorder %v303_v11, %v80_v44 }
  0x9e   :  { %v142_v51 = vmul.f32 30.0, %v126_v41  ;;  %v137_v52 = vmul.f32 30.0, %v121_v43  ;;  %v113_v53 = vsel %vm97_vm8, 0.2, %v244_v18  ;;  %v114_v54 = vsel %vm98_vm9, 0.2, %v244_v18 }
  0x9f   :  { %157 = vst [vmem:[#allocation5 + $0x30] sm:$0xff] %v141_v48  ;;  %v138_v55 = vmul.f32 30.0, %v122_v49  ;;  %v129_v56 = vsub.f32 %v36_v45, %v113_v53  ;;  %v130_v57 = vsub.f32 %v37_v46, %v114_v54  ;;  %vm95_vm10 = vcmp.eq.s32.totalorder %v300_v10, %v77_v47 }
  0xa0   :  { %158 = vst [vmem:[#allocation5 + $0x38] sm:$0xff] %v142_v51  ;;  %153 = vst [vmem:[#allocation5 + $0x10] sm:$0xff] %v137_v52  ;;  %vm96_vm11 = vcmp.eq.s32.totalorder %v303_v11, %v77_v47  ;;  %v111_v59 = vsel %vm95_vm10, 0.2, %v244_v18  ;;  %v86_v60 = vpop.permute.xlu1 %85  ;;  %v83_v61 = vpop.permute.xlu0 %82 }
  0xa1   :  { %154 = vst [vmem:[#allocation5 + $0x18] sm:$0xff] %v138_v55  ;;  %v145_v62 = vmul.f32 30.0, %v129_v56  ;;  %v146_v63 = vmul.f32 30.0, %v130_v57  ;;  %v112_v0 = vsel %vm96_vm11, 0.2, %v244_v18  ;;  %v127_v1 = vsub.f32 %v34_v50, %v111_v59 }
  0xa2   :  { %v128_v4 = vsub.f32 %v35_v58, %v112_v0  ;;  %vm101_vm12 = vcmp.eq.s32.totalorder %v300_v10, %v86_v60  ;;  %vm102_vm13 = vcmp.eq.s32.totalorder %v303_v11, %v86_v60  ;;  %vm99_vm14 = vcmp.eq.s32.totalorder %v300_v10, %v83_v61 }
  0xa3   :  { %161 = vst [vmem:[#allocation5 + $0x50] sm:$0xff] %v145_v62  ;;  %162 = vst [vmem:[#allocation5 + $0x58] sm:$0xff] %v146_v63  ;;  %v143_v6 = vmul.f32 30.0, %v127_v1  ;;  %v117_v7 = vsel %vm101_vm12, 0.2, %v244_v18  ;;  %vm100_vm15 = vcmp.eq.s32.totalorder %v303_v11, %v83_v61 }
  0xa4   :  { %v118_v8 = vsel %vm102_vm13, 0.2, %v244_v18  ;;  %v144_v12 = vmul.f32 30.0, %v128_v4  ;;  %v133_v13 = vsub.f32 %v40_v2, %v117_v7  ;;  %v115_v15 = vsel %vm99_vm14, 0.2, %v244_v18 }
  0xa5   :  { %v134_v14 = vsub.f32 %v41_v3, %v118_v8  ;;  %159 = vst [vmem:[#allocation5 + $0x40] sm:$0xff] %v143_v6  ;;  %v116_v16 = vsel %vm100_vm15, 0.2, %v244_v18  ;;  %v131_v17 = vsub.f32 %v38_v5, %v115_v15 }
  0xa6   :  { %160 = vst [vmem:[#allocation5 + $0x48] sm:$0xff] %v144_v12  ;;  %v149_v10 = vmul.f32 30.0, %v133_v13  ;;  %v132_v20 = vsub.f32 %v39_v9, %v116_v16 }
  0xa7   :  { %v150_v19 = vmul.f32 30.0, %v134_v14  ;;  %v147_v21 = vmul.f32 30.0, %v131_v17 }
  0xa8   :  { %165 = vst [vmem:[#allocation5 + $0x70] sm:$0xff] %v149_v10  ;;  %v148_v22 = vmul.f32 30.0, %v132_v20 }
  0xa9   :  { %166 = vst [vmem:[#allocation5 + $0x78] sm:$0xff] %v150_v19  ;;  %163 = vst [vmem:[#allocation5 + $0x60] sm:$0xff] %v147_v21 }
  0xaa   :  { %164 = vst [vmem:[#allocation5 + $0x68] sm:$0xff] %v148_v22 }
  0xab   :  { %225 = shalt.err (!%p222_p12)
}
  0xac   :  { %s226_s14 = scalar_lea.hbm %s354_s2, 2048 }
  0xad   :  { %p227_p13 = scmp.ne.s32.totalorder %s354_s2, %s226_s14  ;;  %p230_p0 = scmp.lt.u32.totalorder %s226_s14, %s354_s2 }
  0xaf   :  { %p232_p1 = pnand %p230_p0, %p227_p13 }
  0xb1   :  { %235 = shalt.err (!%p232_p1)
}
  0xb2   :  { %178 = dma.vmem_to_hbm [thread:$0]  %s173_s10, 2048, %s354_s2, [#allocation4], %s241_s19, %s241_s19, %s242_s20  }
  0xb3   :  { %238 = dma.done.wait [#allocation4], 2048  }
  0xb4   :  { %239 = vsyncadd [#allocation4], 4294965248 }
  0xb5   :  { %182 = vsyncpa [#allocation3], 1 }
  0xb6   :  { %183 = vsyncpa [#allocation4], 1 }

</bundles_post_ra>
